<compile_context>
chip_gen: v5e
topology: v5e:2x2
jax: 0.10.0
libtpu: 0.0.40
codegen_flags: <defaults>
</compile_context>

<pallas_src>
import functools

import jax
import jax.numpy as jnp
from jax import lax
from jax.experimental import pallas as pl
from jax.experimental.pallas import tpu as pltpu

_EPS = 1e-12  # torch.nn.functional.normalize default eps


def _l2_normalize(x, eps=_EPS):
    # Matches torch.nn.functional.normalize(p=2, dim=1, eps=1e-12).
    norm = jnp.sqrt(jnp.sum(x * x, axis=-1, keepdims=True))
    return x / jnp.maximum(norm, eps)


def _paws_kernel(anchor_ref, positive_ref, k1_ref, k2_ref, oh1_ref, oh2_ref,
                 out1_ref, out2_ref, *, inv_tau):
    """One grid step: both branches for one tile of unlabeled queries.

    k*/oh* are small, pre-normalized, and resident across grid steps
    (constant index_map) -> no per-step renormalization, no re-DMA.
    """

    def pseudo_label(q_raw, k, oh, out_ref):
        q = q_raw.astype(jnp.float32)
        # Fold 1/||q|| (torch clamp max(||q||, eps) == rsqrt(max(sumsq, eps^2)))
        # and 1/tau into one row-broadcast scale applied to the small (tm, h)
        # similarity matrix instead of dividing the d-wide query tile.
        sumsq = jnp.sum(q * q, axis=-1, keepdims=True)                 # (tm, 1)
        row_scale = lax.rsqrt(jnp.maximum(sumsq, _EPS * _EPS)) * inv_tau

        # MXU matmul contracting feature dims directly (no k.T relayout).
        s = lax.dot_general(
            q, k, dimension_numbers=(((1,), (1,)), ((), ())),
            preferred_element_type=jnp.float32) * row_scale            # (tm, h)

        # Numerically stable softmax over the support axis, with the divide
        # folded past the (linear) one-hot mix: (e @ oh) * 1/sum(e).
        m = jnp.max(s, axis=-1, keepdims=True)
        e = jnp.exp(s - m)
        denom = jnp.sum(e, axis=-1, keepdims=True)                     # (tm, 1)
        num = jnp.dot(e, oh, preferred_element_type=jnp.float32)       # (tm, c)
        # pl.reciprocal(..., approx=True) would push this onto the EUP at
        # ~2^-12 rel error; keep the exact form to stay within 1e-5 of ref.
        out_ref[...] = (num * pl.reciprocal(denom)).astype(out_ref.dtype)

    pseudo_label(anchor_ref[...], k1_ref[...], oh1_ref[...], out1_ref)
    pseudo_label(positive_ref[...], k2_ref[...], oh2_ref[...], out2_ref)


def _choose_tile_and_vmem(b_ulb, d, c, h1, h2, q_itemsize, max_tile_m):
    """Pick a sublane-aligned query tile and an explicit scoped-VMEM limit."""
    if b_ulb <= 8:
        tm = b_ulb                      # full-extent block (always legal)
    else:
        # Prefer >= 2 grid steps so the "parallel" axis can shard across the
        # two v7x TensorCores; round to a sublane multiple of 8.
        half = ((b_ulb + 1) // 2 + 7) // 8 * 8
        tm = max(8, min(max_tile_m, half) // 8 * 8)

    def est(t):
        qbuf = 2 * 2 * t * d * q_itemsize            # 2 query inputs, 2 buffers
        resident = 2 * (h1 + h2) * (d + c) * 4       # supports + one-hots (f32)
        out = 2 * 2 * t * c * 4                      # 2 f32 outputs, 2 buffers
        return qbuf + resident + out

    budget = 40 << 20                                # v7x-safe (64 MiB VMEM)
    while tm > 8 and est(tm) > budget:
        tm = max(8, (tm // 2) // 8 * 8)

    vmem_limit = int(min(max(est(tm) * 5 // 4, 16 << 20), 48 << 20))
    return tm, vmem_limit


def _reference_pseudo_labels(anchor_feat, positive_feat, lb_feat, lb_one_hot, tau):
    """Pure-JAX reference (also the fallback for degenerate shapes)."""
    h1 = -(-lb_feat.shape[0] // 2)
    k1 = _l2_normalize(lb_feat[:h1].astype(jnp.float32))
    k2 = _l2_normalize(lb_feat[h1:].astype(jnp.float32))
    oh1 = lb_one_hot[:h1].astype(jnp.float32)
    oh2 = lb_one_hot[h1:].astype(jnp.float32)
    q1 = _l2_normalize(anchor_feat.astype(jnp.float32))
    q2 = _l2_normalize(positive_feat.astype(jnp.float32))
    p1 = jax.nn.softmax(q1 @ k1.T / tau, axis=1)
    p2 = jax.nn.softmax(q2 @ k2.T / tau, axis=1)
    return p1 @ oh1, p2 @ oh2


def paws_pseudo_labels(anchor_feat, positive_feat, lb_feat, lb_one_hot, tau,
                       *, max_tile_m=1024):
    """Fused kernel producing (logits_x_ulb_1, logits_x_ulb_2) in float32."""
    b_ulb, d = anchor_feat.shape
    b_lb = lb_feat.shape[0]
    c = lb_one_hot.shape[1]

    # torch.chunk(2, dim=0): first chunk gets ceil(n/2) rows.
    h1 = -(-b_lb // 2)
    h2 = b_lb - h1

    # Degenerate shapes would need zero-sized BlockSpecs -> pure-JAX fallback.
    if b_ulb == 0 or h1 == 0 or h2 == 0:
        return _reference_pseudo_labels(
            anchor_feat, positive_feat, lb_feat, lb_one_hot, tau)

    # Normalize support halves ONCE here (tiny op on small arrays).
    k1 = _l2_normalize(lb_feat[:h1].astype(jnp.float32))
    k2 = _l2_normalize(lb_feat[h1:].astype(jnp.float32))
    oh1 = lb_one_hot[:h1].astype(jnp.float32)
    oh2 = lb_one_hot[h1:].astype(jnp.float32)

    tm, vmem_limit = _choose_tile_and_vmem(
        b_ulb, d, c, h1, h2, anchor_feat.dtype.itemsize, max_tile_m)
    grid = (pl.cdiv(b_ulb, tm),)

    kernel = functools.partial(_paws_kernel, inv_tau=float(1.0 / tau))

    q_spec = pl.BlockSpec((tm, d), lambda i: (i, 0))        # tiled query rows
    out_spec = pl.BlockSpec((tm, c), lambda i: (i, 0))
    # TODO(synk): if upstream c stays far below 128 lanes, consider packing both
    # branches into one (tm, 2c) output for lane-denser stores.

    grid_spec = pltpu.PrefetchScalarGridSpec(
        num_scalar_prefetch=0,
        grid=grid,
        in_specs=[
            q_spec,                                          # anchor (tiled)
            q_spec,                                          # positive (tiled)
            pl.BlockSpec((h1, d), lambda i: (0, 0)),         # k1 (resident)
            pl.BlockSpec((h2, d), lambda i: (0, 0)),         # k2 (resident)
            pl.BlockSpec((h1, c), lambda i: (0, 0)),         # oh1 (resident)
            pl.BlockSpec((h2, c), lambda i: (0, 0)),         # oh2 (resident)
        ],
        out_specs=[out_spec, out_spec],
    )

    return pl.pallas_call(
        kernel,
        out_shape=(jax.ShapeDtypeStruct((b_ulb, c), jnp.float32),
                   jax.ShapeDtypeStruct((b_ulb, c), jnp.float32)),
        grid_spec=grid_spec,
        compiler_params=pltpu.CompilerParams(
            dimension_semantics=("parallel",),
            vmem_limit_bytes=vmem_limit),
    )(anchor_feat, positive_feat, k1, k2, oh1, oh2)


@functools.partial(jax.jit, static_argnames=("tau",))
def paws_nonparametric_forward(anchor_feat, positive_feat, lb_feat, lb_one_hot,
                               logits_x_lb, logits_x_ulb_1, logits_x_ulb_2,
                               tau):
    """Mirrors PAWSNonParametric.forward (tau = args.aggregator_tau)."""
    del logits_x_ulb_1, logits_x_ulb_2  # overwritten, as in the reference
    new_ulb_1, new_ulb_2 = paws_pseudo_labels(
        anchor_feat, positive_feat, lb_feat, lb_one_hot, tau)
    # Passthrough outputs: return the original arrays directly (no copy kernel).
    return (anchor_feat, positive_feat, lb_feat, lb_one_hot,
            logits_x_lb, new_ulb_1, new_ulb_2)


if __name__ == "__main__":
    class Args:
        aggregator_tau = 0.1

    args = Args()

    key = jax.random.PRNGKey(0)
    k = jax.random.split(key, 7)

    batch_lb = 8      # labeled batch (split into two halves of 4)
    batch_ulb = 16    # unlabeled batch
    hidden = 32       # feature dim
    num_classes = 8   # logits / one-hot dim

    anchor_feat = jax.random.normal(k[0], (batch_ulb, hidden), dtype=jnp.float32)
    positive_feat = jax.random.normal(k[1], (batch_ulb, hidden), dtype=jnp.float32)
    lb_feat = jax.random.normal(k[2], (batch_lb, hidden), dtype=jnp.float32)
    lb_one_hot = jax.nn.one_hot(
        jax.random.randint(k[3], (batch_lb,), 0, num_classes), num_classes,
        dtype=jnp.float32)
    logits_x_lb = jax.random.normal(k[4], (batch_lb, num_classes), dtype=jnp.float32)
    logits_x_ulb_1 = jax.random.normal(k[5], (batch_ulb, num_classes), dtype=jnp.float32)
    logits_x_ulb_2 = jax.random.normal(k[6], (batch_ulb, num_classes), dtype=jnp.float32)

    outputs = paws_nonparametric_forward(
        anchor_feat, positive_feat, lb_feat, lb_one_hot,
        logits_x_lb, logits_x_ulb_1, logits_x_ulb_2,
        tau=float(args.aggregator_tau))
    outputs = jax.block_until_ready(outputs)

    (out_anchor, out_positive, out_lb_feat, out_lb_oh,
     out_logits_lb, out_ulb_1, out_ulb_2) = outputs

    # Passthrough outputs must be exact.
    for x, y in ((anchor_feat, out_anchor), (positive_feat, out_positive),
                 (lb_feat, out_lb_feat), (lb_one_hot, out_lb_oh),
                 (logits_x_lb, out_logits_lb)):
        assert x.shape == y.shape and x.dtype == y.dtype
        assert bool(jnp.all(x == y))

    # Pseudo-label outputs vs pure-JAX reference.
    ref_1, ref_2 = _reference_pseudo_labels(
        anchor_feat, positive_feat, lb_feat, lb_one_hot, args.aggregator_tau)
    assert out_ulb_1.shape == (batch_ulb, num_classes)
    assert out_ulb_2.shape == (batch_ulb, num_classes)
    assert out_ulb_1.dtype == jnp.float32 and out_ulb_2.dtype == jnp.float32
    assert bool(jnp.allclose(out_ulb_1, ref_1, rtol=1e-5, atol=1e-5))
    assert bool(jnp.allclose(out_ulb_2, ref_2, rtol=1e-5, atol=1e-5))

    print("KERNEL_OK")
</pallas_src>

<mosaic_0001>
module attributes {stable_mosaic.version = 11 : i64} {
  func.func @_paws_kernel(%arg0: i32, %arg1: memref<8x32xf32, #tpu.memory_space<vmem>>, %arg2: memref<8x32xf32, #tpu.memory_space<vmem>>, %arg3: memref<4x32xf32, #tpu.memory_space<vmem>>, %arg4: memref<4x32xf32, #tpu.memory_space<vmem>>, %arg5: memref<4x8xf32, #tpu.memory_space<vmem>>, %arg6: memref<4x8xf32, #tpu.memory_space<vmem>>, %arg7: memref<8x8xf32, #tpu.memory_space<vmem>>, %arg8: memref<8x8xf32, #tpu.memory_space<vmem>>) attributes {dimension_semantics = [#tpu.dimension_semantics<parallel>], iteration_bounds = array<i64: 2>, scalar_prefetch = 0 : i64, scratch_operands = 0 : i64, tpu.core_type = #tpu.core_type<tc>, window_params = [{transform_indices = @transform_0, window_bounds = array<i64: 8, 32>}, {transform_indices = @transform_1, window_bounds = array<i64: 8, 32>}, {pipeline_mode = #tpu.pipeline_mode<synchronous>, transform_indices = @transform_2, window_bounds = array<i64: 4, 32>}, {pipeline_mode = #tpu.pipeline_mode<synchronous>, transform_indices = @transform_3, window_bounds = array<i64: 4, 32>}, {pipeline_mode = #tpu.pipeline_mode<synchronous>, transform_indices = @transform_4, window_bounds = array<i64: 4, 8>}, {pipeline_mode = #tpu.pipeline_mode<synchronous>, transform_indices = @transform_5, window_bounds = array<i64: 4, 8>}, {transform_indices = @transform_6, window_bounds = array<i64: 8, 8>}, {transform_indices = @transform_7, window_bounds = array<i64: 8, 8>}]} {
    %c0 = arith.constant 0 : index
    %c0_0 = arith.constant 0 : index
    %0 = vector.load %arg1[%c0, %c0_0] : memref<8x32xf32, #tpu.memory_space<vmem>>, vector<8x32xf32>
    %c0_1 = arith.constant 0 : index
    %c0_2 = arith.constant 0 : index
    %1 = vector.load %arg3[%c0_1, %c0_2] : memref<4x32xf32, #tpu.memory_space<vmem>>, vector<4x32xf32>
    %c0_3 = arith.constant 0 : index
    %c0_4 = arith.constant 0 : index
    %2 = vector.load %arg5[%c0_3, %c0_4] : memref<4x8xf32, #tpu.memory_space<vmem>>, vector<4x8xf32>
    %3 = arith.mulf %0, %0 : vector<8x32xf32>
    %cst = arith.constant dense<0.000000e+00> : vector<8xf32>
    %4 = vector.multi_reduction <add>, %3, %cst [1] : vector<8x32xf32> to vector<8xf32>
    %5 = vector.shape_cast %4 : vector<8xf32> to vector<8x1xf32>
    %cst_5 = arith.constant 1.000000e-24 : f32
    %6 = vector.broadcast %cst_5 : f32 to vector<8x1xf32>
    %7 = arith.maximumf %5, %6 : vector<8x1xf32>
    %8 = math.rsqrt %7 : vector<8x1xf32>
    %cst_6 = arith.constant 1.000000e+01 : f32
    %9 = vector.broadcast %cst_6 : f32 to vector<8x1xf32>
    %10 = arith.mulf %8, %9 : vector<8x1xf32>
    %cst_7 = arith.constant dense<0.000000e+00> : vector<8x4xf32>
    %11 = tpu.matmul %0, %1, %cst_7 {dimension_numbers = #tpu.dot_dimension_numbers<[1], [1], [0], [0], [0, 0, 1, 0], [], []>} : vector<8x32xf32>, vector<4x32xf32>, vector<8x4xf32> -> vector<8x4xf32>
    %12 = vector.broadcast %10 : vector<8x1xf32> to vector<8x4xf32>
    %13 = arith.mulf %11, %12 : vector<8x4xf32>
    %cst_8 = arith.constant dense<0xFF800000> : vector<8xf32>
    %14 = vector.multi_reduction <maximumf>, %13, %cst_8 [1] : vector<8x4xf32> to vector<8xf32>
    %15 = vector.shape_cast %14 : vector<8xf32> to vector<8x1xf32>
    %16 = vector.broadcast %15 : vector<8x1xf32> to vector<8x4xf32>
    %17 = arith.subf %13, %16 : vector<8x4xf32>
    %18 = math.exp %17 : vector<8x4xf32>
    %cst_9 = arith.constant dense<0.000000e+00> : vector<8xf32>
    %19 = vector.multi_reduction <add>, %18, %cst_9 [1] : vector<8x4xf32> to vector<8xf32>
    %20 = vector.shape_cast %19 : vector<8xf32> to vector<8x1xf32>
    %cst_10 = arith.constant dense<0.000000e+00> : vector<8x8xf32>
    %21 = tpu.matmul %18, %2, %cst_10 {dimension_numbers = #tpu.dot_dimension_numbers<[1], [0], [0], [1], [0, 0, 1, 1], [], []>} : vector<8x4xf32>, vector<4x8xf32>, vector<8x8xf32> -> vector<8x8xf32>
    %22 = tpu.reciprocal %20 : vector<8x1xf32> -> vector<8x1xf32>
    %23 = vector.broadcast %22 : vector<8x1xf32> to vector<8x8xf32>
    %24 = arith.mulf %21, %23 : vector<8x8xf32>
    %c0_11 = arith.constant 0 : index
    %c0_12 = arith.constant 0 : index
    %25 = vector.load %arg7[%c0_11, %c0_12] : memref<8x8xf32, #tpu.memory_space<vmem>>, vector<8x8xf32>
    tpu.vector_store %arg7[%c0_11, %c0_12], %24 {strides = array<i32>} : memref<8x8xf32, #tpu.memory_space<vmem>>, vector<8x8xf32>,
    %c0_13 = arith.constant 0 : index
    %c0_14 = arith.constant 0 : index
    %26 = vector.load %arg2[%c0_13, %c0_14] : memref<8x32xf32, #tpu.memory_space<vmem>>, vector<8x32xf32>
    %c0_15 = arith.constant 0 : index
    %c0_16 = arith.constant 0 : index
    %27 = vector.load %arg4[%c0_15, %c0_16] : memref<4x32xf32, #tpu.memory_space<vmem>>, vector<4x32xf32>
    %c0_17 = arith.constant 0 : index
    %c0_18 = arith.constant 0 : index
    %28 = vector.load %arg6[%c0_17, %c0_18] : memref<4x8xf32, #tpu.memory_space<vmem>>, vector<4x8xf32>
    %29 = arith.mulf %26, %26 : vector<8x32xf32>
    %cst_19 = arith.constant dense<0.000000e+00> : vector<8xf32>
    %30 = vector.multi_reduction <add>, %29, %cst_19 [1] : vector<8x32xf32> to vector<8xf32>
    %31 = vector.shape_cast %30 : vector<8xf32> to vector<8x1xf32>
    %cst_20 = arith.constant 1.000000e-24 : f32
    %32 = vector.broadcast %cst_20 : f32 to vector<8x1xf32>
    %33 = arith.maximumf %31, %32 : vector<8x1xf32>
    %34 = math.rsqrt %33 : vector<8x1xf32>
    %cst_21 = arith.constant 1.000000e+01 : f32
    %35 = vector.broadcast %cst_21 : f32 to vector<8x1xf32>
    %36 = arith.mulf %34, %35 : vector<8x1xf32>
    %cst_22 = arith.constant dense<0.000000e+00> : vector<8x4xf32>
    %37 = tpu.matmul %26, %27, %cst_22 {dimension_numbers = #tpu.dot_dimension_numbers<[1], [1], [0], [0], [0, 0, 1, 0], [], []>} : vector<8x32xf32>, vector<4x32xf32>, vector<8x4xf32> -> vector<8x4xf32>
    %38 = vector.broadcast %36 : vector<8x1xf32> to vector<8x4xf32>
    %39 = arith.mulf %37, %38 : vector<8x4xf32>
    %cst_23 = arith.constant dense<0xFF800000> : vector<8xf32>
    %40 = vector.multi_reduction <maximumf>, %39, %cst_23 [1] : vector<8x4xf32> to vector<8xf32>
    %41 = vector.shape_cast %40 : vector<8xf32> to vector<8x1xf32>
    %42 = vector.broadcast %41 : vector<8x1xf32> to vector<8x4xf32>
    %43 = arith.subf %39, %42 : vector<8x4xf32>
    %44 = math.exp %43 : vector<8x4xf32>
    %cst_24 = arith.constant dense<0.000000e+00> : vector<8xf32>
    %45 = vector.multi_reduction <add>, %44, %cst_24 [1] : vector<8x4xf32> to vector<8xf32>
    %46 = vector.shape_cast %45 : vector<8xf32> to vector<8x1xf32>
    %cst_25 = arith.constant dense<0.000000e+00> : vector<8x8xf32>
    %47 = tpu.matmul %44, %28, %cst_25 {dimension_numbers = #tpu.dot_dimension_numbers<[1], [0], [0], [1], [0, 0, 1, 1], [], []>} : vector<8x4xf32>, vector<4x8xf32>, vector<8x8xf32> -> vector<8x8xf32>
    %48 = tpu.reciprocal %46 : vector<8x1xf32> -> vector<8x1xf32>
    %49 = vector.broadcast %48 : vector<8x1xf32> to vector<8x8xf32>
    %50 = arith.mulf %47, %49 : vector<8x8xf32>
    %c0_26 = arith.constant 0 : index
    %c0_27 = arith.constant 0 : index
    %51 = vector.load %arg8[%c0_26, %c0_27] : memref<8x8xf32, #tpu.memory_space<vmem>>, vector<8x8xf32>
    tpu.vector_store %arg8[%c0_26, %c0_27], %50 {strides = array<i32>} : memref<8x8xf32, #tpu.memory_space<vmem>>, vector<8x8xf32>,
    return
  }
  func.func @transform_0(%arg0: i32) -> (i32, i32) {
    %c0_i32 = arith.constant 0 : i32
    %c0_i32_0 = arith.constant 0 : i32
    return %arg0, %c0_i32 : i32, i32
  }
  func.func @transform_1(%arg0: i32) -> (i32, i32) {
    %c0_i32 = arith.constant 0 : i32
    %c0_i32_0 = arith.constant 0 : i32
    return %arg0, %c0_i32 : i32, i32
  }
  func.func @transform_2(%arg0: i32) -> (i32, i32) {
    %c0_i32 = arith.constant 0 : i32
    %c0_i32_0 = arith.constant 0 : i32
    %c0_i32_1 = arith.constant 0 : i32
    return %c0_i32, %c0_i32_0 : i32, i32
  }
  func.func @transform_3(%arg0: i32) -> (i32, i32) {
    %c0_i32 = arith.constant 0 : i32
    %c0_i32_0 = arith.constant 0 : i32
    %c0_i32_1 = arith.constant 0 : i32
    return %c0_i32, %c0_i32_0 : i32, i32
  }
  func.func @transform_4(%arg0: i32) -> (i32, i32) {
    %c0_i32 = arith.constant 0 : i32
    %c0_i32_0 = arith.constant 0 : i32
    %c0_i32_1 = arith.constant 0 : i32
    return %c0_i32, %c0_i32_0 : i32, i32
  }
  func.func @transform_5(%arg0: i32) -> (i32, i32) {
    %c0_i32 = arith.constant 0 : i32
    %c0_i32_0 = arith.constant 0 : i32
    %c0_i32_1 = arith.constant 0 : i32
    return %c0_i32, %c0_i32_0 : i32, i32
  }
  func.func @transform_6(%arg0: i32) -> (i32, i32) {
    %c0_i32 = arith.constant 0 : i32
    %c0_i32_0 = arith.constant 0 : i32
    return %arg0, %c0_i32 : i32, i32
  }
  func.func @transform_7(%arg0: i32) -> (i32, i32) {
    %c0_i32 = arith.constant 0 : i32
    %c0_i32_0 = arith.constant 0 : i32
    return %arg0, %c0_i32 : i32, i32
  }
}

</mosaic_0001>

<bundles_post_ra>
// kernel: paws_nonparametric_forward.1
= control target key start
LH: loop header
LB: loop body
LE: loop exit
PB: predicated region body
PF: predicated region fallthrough
CT: control target
= control target key end

     0   :  { %s683_s24 = smov 0   ;;  %s738_s0 = inlined_call_operand.vmem [shape: f32[16,32], index: 0, kind: input, shape index: {}]   ;;  %s739_s1 = inlined_call_operand.vmem [shape: f32[16,32], index: 1, kind: input, shape index: {}]   ;;  %s740_s2 = inlined_call_operand.vmem [shape: f32[4,32], index: 2, kind: input, shape index: {}]   ;;  %s741_s3 = inlined_call_operand.vmem [shape: f32[4,32], index: 3, kind: input, shape index: {}]   ;;  %s742_s4 = inlined_call_operand.vmem [shape: f32[4,8], index: 4, kind: input, shape index: {}]   ;;  %s743_s5 = inlined_call_operand.vmem [shape: f32[4,8], index: 5, kind: input, shape index: {}]   ;;  %s744_s6 = inlined_call_operand.vmem [shape: f32[16,8], index: 6, kind: output, shape index: {0}]   ;;  %s745_s7 = inlined_call_operand.vmem [shape: f32[16,8], index: 7, kind: output, shape index: {1}]  }
   0x1 LB: > { %s596_s25 = sadd.s32 4294967295, %s641_s24   ;;  %p600_p0 = scmp.ge.s32.totalorder %s641_s24, 1  ;;  %s641_s24 = sphi %s683_s24, %s18_s24  }
   0x2   : > { %p248_p1 = scmp.lt.s32.totalorder %s641_s24, 3 }
   0x4   : > { %p249_p2 = pnand %p600_p0, %p248_p1 }
   0x5   : > { %p286_p3 = scmp.lt.s32.totalorder (!%p249_p2), %s596_s25, 1 }
   0x6   : > { %252 = sbr.rel (%p249_p2) target bundleno = 439 (0x1b7), region = 44 }
   0xb   : > { %vm306_vm0 = vcmask 261120   ;;  %v404_v0 = vld [vmem:[%s741_s3] sm:$0xf]  ;;  %s747_s25 = smov (!%p286_p3, %s596_s25), 1  ;;  %vm349_vm4 = vcmask 31744   ;;  %vm362_vm8 = vcmask 1043456  }
   0xc   : > { %v303_v1 = vld [vmem:[%s740_s2] sm:$0xf]  ;;  %609 = vmatpush.xpose.msk.msra.mxu2 %vm306_vm0, %v404_v0  ;;  %s699_s30 = sshll.u32 %s747_s25, 3  ;;  %vm401_vm13 = vcmask 64512  }
   0xd   : > { %605 = vmatpush.xpose.msk.msra.mxu0 %vm306_vm0, %v303_v1  ;;  %s293_s10 = scalar_lea.vmem %s739_s1, %s699_s30  ;;  %s289_s13 = scalar_lea.vmem %s738_s0, %s699_s30  ;;  %v405_v34 = vld [vmem:[%s743_s5] sm:$0xf] }
   0xe   : > { %v403_v2 = vld [vmem:[%s293_s10] sm:$0xff]  ;;  %611 = vmatpush.msk.msra.mxu3 %vm362_vm8, %v405_v34  ;;  %s297_s20 = scalar_lea.vmem %s744_s6, %s699_s30  ;;  %s301_s23 = scalar_lea.vmem %s745_s7, %s699_s30 }
   0xf   : > { %v406_v3 = vmul.f32 %v403_v2, %v403_v2  ;;  %610 = vmatmul.msk.f32.vlgmr.msra.gmra.mxu2 %vm306_vm0, %v403_v2  ;;  %v302_v4 = vld [vmem:[%s289_s13] sm:$0xff] }
  0x10   : > { %606 = vmatmul.msk.f32.vlgmr.msra.gmra.mxu0 %vm306_vm0, %v302_v4  ;;  %v305_v6 = vmul.f32 %v302_v4, %v302_v4  ;;  %v304_v35 = vld [vmem:[%s742_s4] sm:$0xf] }
  0x11   : > { %v407_v5 = vsel %vm306_vm0, %v406_v3, 0.0  ;;  %607 = vmatpush.msk.msra.mxu1 %vm362_vm8, %v304_v35 }
  0x12   : > { %408 = vadd.xlane.f32.xlu0 %v407_v5  ;;  %v307_v7 = vsel %vm306_vm0, %v305_v6, 0.0 }
  0x1a   : > { %308 = vadd.xlane.f32.xlu0 %v307_v7 }
  0x85   : > { %v409_v8 = vpop.xlane.xlu0 %408 }
  0x86   : > { %v410_v9 = vmax.f32 %v409_v8, 1e-24 }
  0x88   : > { %623 = vrsqrt.f32 %v410_v9  ;;  %vm417_vm2 = vweird.f32 %v410_v9 }
  0x8d   : > { %v309_v10 = vpop.xlane.xlu0 %308  ;;  %v345_v30 = vpop.f32.mrf.mxu0 }
  0x8e   : > { %v624_v11 = vpop.eup %623  ;;  %v310_v12 = vmax.f32 %v309_v10, 1e-24 }
  0x8f   : > { %v412_v13 = vmul.f32 %v624_v11, %v410_v9  ;;  %vm418_vm1 = vweird.f32 %v624_v11 }
  0x90   : > { %625 = vrsqrt.f32 %v310_v12  ;;  %vm419_vm3 = vmor %vm417_vm2, %vm418_vm1  ;;  %vm317_vm6 = vweird.f32 %v310_v12 }
  0x91   : > { %v413_v14 = vmul.f32 %v624_v11, %v412_v13 }
  0x92   : > { %v445_v22 = vpop.f32.mrf.mxu2 }
  0x93   : > { %v414_v15 = vmul.f32 0.5, %v413_v14 }
  0x95   : > { %v415_v16 = vsub.f32 1.5, %v414_v15 }
  0x96   : > { %v626_v17 = vpop.eup %625 }
  0x97   : > { %v312_v18 = vmul.f32 %v626_v17, %v310_v12  ;;  %v416_v19 = vmul.f32 %v624_v11, %v415_v16  ;;  %vm318_vm5 = vweird.f32 %v626_v17 }
  0x98   : > { %vm319_vm7 = vmor %vm317_vm6, %vm318_vm5 }
  0x99   : > { %v313_v20 = vmul.f32 %v626_v17, %v312_v18  ;;  %v420_v21 = vsel %vm419_vm3, %v624_v11, %v416_v19 }
  0x9a   : > { %v421_v23 = vmul.f32 10.0, %v420_v21 }
  0x9b   : > { %v314_v24 = vmul.f32 0.5, %v313_v20 }
  0x9c   : > { %v448_v25 = vmul.f32 %v445_v22, %v421_v23 }
  0x9d   : > { %v315_v26 = vsub.f32 1.5, %v314_v24 }
  0x9e   : > { %v449_v27 = vsel %vm349_vm4, %v448_v25, -inf }
  0x9f   : > { %450 = vmax.xlane.f32.xlu1 %v449_v27  ;;  %v316_v28 = vmul.f32 %v626_v17, %v315_v26 }
  0xa1   : > { %v320_v29 = vsel %vm319_vm7, %v626_v17, %v316_v28 }
  0xa2   : > { %v321_v31 = vmul.f32 10.0, %v320_v29 }
  0xa4   : > { %v348_v32 = vmul.f32 %v345_v30, %v321_v31 }
  0xa6   : > { %v350_v33 = vsel %vm349_vm4, %v348_v32, -inf }
  0xa7   : > { %351 = vmax.xlane.f32.xlu1 %v350_v33 }
 0x112   : > { %v451_v36 = vpop.xlane.xlu1 %450 }
 0x113   : > { %v452_v37 = vsub.f32 %v448_v25, %v451_v36 }
 0x115   : > { %v453_v38 = vmul.f32 1.442695, %v452_v37 }
 0x117   : > { %627 = vpow2.f32 %v453_v38 }
 0x11a   : > { %v352_v39 = vpop.xlane.xlu1 %351 }
 0x11b   : > { %v353_v40 = vsub.f32 %v348_v32, %v352_v39 }
 0x11d   : > { %v628_v41 = vpop.eup %627  ;;  %v354_v42 = vmul.f32 1.442695, %v353_v40 }
 0x11e   : > { %612 = vmatmul.msk.f32.vlgmr.msra.gmra.mxu3 %vm349_vm4, %v628_v41  ;;  %v455_v45 = vsel %vm349_vm4, %v628_v41, 0.0 }
 0x11f   : > { %629 = vpow2.f32 %v354_v42 }
 0x125   : > { %v630_v43 = vpop.eup %629 }
 0x126   : > { %608 = vmatmul.msk.f32.vlgmr.msra.gmra.mxu1 %vm349_vm4, %v630_v43  ;;  %v356_v44 = vsel %vm349_vm4, %v630_v43, 0.0 }
 0x127   : > { %357 = vadd.xlane.f32.xlu2 %v356_v44 }
 0x12f   : > { %456 = vadd.xlane.f32.xlu2 %v455_v45 }
 0x19a   : > { %v358_v46 = vpop.xlane.xlu2 %357 }
 0x19b   : > { %631 = vrcp.f32 %v358_v46  ;;  %v397_v51 = vand.u32 2147483648, %v358_v46  ;;  %v395_v53 = vand.u32 2147483647, %v358_v46  ;;  %vm391_vm10 = vweird.f32 %v358_v46 }
 0x19d   : > { %v398_v56 = vor.u32 1.1754944e-38, %v397_v51  ;;  %vm396_vm12 = vcmp.eq.f32.partialorder %v395_v53, 8.507059e+37 }
 0x1a1   : > { %v632_v47 = vpop.eup %631  ;;  %v481_v5 = vpop.f32.mrf.mxu3 }
 0x1a2   : > { %v387_v48 = vmul.f32 %v632_v47, %v358_v46  ;;  %v457_v49 = vpop.xlane.xlu2 %456  ;;  %vm392_vm9 = vweird.f32 %v632_v47 }
 0x1a3   : > { %633 = vrcp.f32 %v457_v49  ;;  %vm393_vm11 = vmor %vm391_vm10, %vm392_vm9  ;;  %v383_v59 = vpop.f32.mrf.mxu1  ;;  %v495_v63 = vand.u32 2147483648, %v457_v49  ;;  %v493_v1 = vand.u32 2147483647, %v457_v49  ;;  %vm489_vm15 = vweird.f32 %v457_v49 }
 0x1a4   : > { %v388_v50 = vsub.f32 1.0, %v387_v48 }
 0x1a5   : > { %v496_v3 = vor.u32 1.1754944e-38, %v495_v63  ;;  %vm494_vm1 = vcmp.eq.f32.partialorder %v493_v1, 8.507059e+37 }
 0x1a6   : > { %v389_v52 = vmul.f32 %v632_v47, %v388_v50 }
 0x1a8   : > { %v390_v54 = vadd.f32 %v632_v47, %v389_v52 }
 0x1a9   : > { %v634_v55 = vpop.eup %633 }
 0x1aa   : > { %v485_v57 = vmul.f32 %v634_v55, %v457_v49  ;;  %v394_v58 = vsel %vm393_vm11, %v632_v47, %v390_v54  ;;  %vm490_vm14 = vweird.f32 %v634_v55 }
 0x1ab   : > { %v399_v60 = vsel %vm396_vm12, %v398_v56, %v394_v58  ;;  %vm491_vm0 = vmor %vm489_vm15, %vm490_vm14 }
 0x1ac   : > { %v486_v61 = vsub.f32 1.0, %v485_v57  ;;  %v400_v62 = vmul.f32 %v399_v60, %v383_v59 }
 0x1ae   : > { %v487_v0 = vmul.f32 %v634_v55, %v486_v61  ;;  %402 = vst.msk [vmem:[%s297_s20] sm:$0xff] %vm401_vm13, %v400_v62 }
 0x1b0   : > { %v488_v2 = vadd.f32 %v634_v55, %v487_v0 }
 0x1b2   : > { %v492_v4 = vsel %vm491_vm0, %v634_v55, %v488_v2 }
 0x1b3   : > { %v497_v6 = vsel %vm494_vm1, %v496_v3, %v492_v4 }
 0x1b4   : > { %v498_v7 = vmul.f32 %v497_v6, %v481_v5 }
 0x1b6   : > { %499 = vst.msk [vmem:[%s301_s23] sm:$0xff] %vm401_vm13, %v498_v7 }
 0x1b7 PF: > { %s18_s24 = sadd.s32 1, %s641_s24  }
 0x1b8   : > { %p15_p4 = scmp.ge.s32.totalorder %s18_s24, 4  }
 0x1ba   :  { %17 = sbr.rel (!%p15_p4) target bundleno = 1 (0x1), region = 89 }

</bundles_post_ra>
